<compile_context>
chip_gen: v6e
topology: v6e:2x2x1
jax: 0.10.0
libtpu: 0.0.40
codegen_flags: <defaults>
</compile_context>

<pallas_src>
import math
import numpy as np
import jax
import jax.numpy as jnp
from jax.experimental import pallas as pl
from jax.experimental.pallas import tpu as pltpu

# ----- hyper-params matching TacotronAbstract defaults, scaled down ---------
GST_EMBEDDING_DIM = 128                      # gst_embedding_dim (512 -> 128)
GST_NUM_HEADS = 4                            # gst_num_heads
GST_STYLE_TOKENS = 10                        # gst_style_tokens
KEY_DIM = GST_EMBEDDING_DIM // GST_NUM_HEADS # per-token key dim (GST convention)
QUERY_DIM = GST_EMBEDDING_DIM // 2           # query dim (no speaker embedding)
ENCODER_DIM = 128                            # encoder_in_features (512 -> 128)
DECODER_R = 2                                # decoder.r

_VMEM = pl.BlockSpec(memory_space=pltpu.MemorySpace.VMEM)


def _round_up(x, m):
    return ((x + m - 1) // m) * m


def _row_block(rows, max_blk=512):
    """Row tile for (B*T, D) kernels.

    Guarantees >=2 grid steps whenever rows > 8 (so dimension_semantics
    ("parallel",) can shard across v7x's 2 TensorCores) while keeping blocks
    a multiple of 8 sublanes and <= max_blk rows (VMEM-safe at real widths).
    """
    if rows <= 8:
        return rows
    half = _round_up((rows + 1) // 2, 8)
    return min(max_blk, half)


def _compiler_params(working_set_bytes):
    kwargs = dict(dimension_semantics=("parallel",))
    # v5e's scoped-VMEM default is only 16 MiB; give explicit headroom if the
    # double-buffered working set ever grows (no-op at demo sizes).
    if working_set_bytes > 12 * 1024 * 1024:
        kwargs["vmem_limit_bytes"] = min(48 << 20, 2 * working_set_bytes + (4 << 20))
    return pltpu.CompilerParams(**kwargs)


def _const_spec(arr):
    shp = tuple(arr.shape)
    return pl.BlockSpec(shp, lambda i, _n=len(shp): (0,) * _n)


# ---------------------------------------------------------------------------
# GST core math (shared by the fused concat / add kernels).
# softmax over a single key position is identically 1, so
#   gst = (amp_sel @ tanh(tokens)) @ w_v
# logits (last dict entry only, as torch keeps only the last attention's):
#   logits[h] = sum_{d in head h} (query @ w_q)[d] * (tanh(tok_last) @ w_k)[d] / sqrt(U/H)
# ---------------------------------------------------------------------------
def _gst_core(tokens_ref, wq_ref, wk_ref, wv_ref, query_ref,
              amp_sel_ref, last_sel_ref, head_sel_ref):
    U = wv_ref.shape[1]
    # scale uses num_units // num_heads (matches torch MultiHeadAttention)
    scale = 1.0 / math.sqrt(float(U // GST_NUM_HEADS))

    t = jnp.tanh(tokens_ref[...])                                      # (n_tok, Kd) EUP
    w_tok = jnp.dot(amp_sel_ref[...], t,
                    preferred_element_type=jnp.float32)                # (1, Kd)
    gst = jnp.dot(w_tok, wv_ref[...],
                  preferred_element_type=jnp.float32)                  # (1, U)

    qp = jnp.dot(query_ref[...], wq_ref[...],
                 preferred_element_type=jnp.float32)                   # (1, U)
    k_last = jnp.dot(jnp.dot(last_sel_ref[...], t,
                             preferred_element_type=jnp.float32),
                     wk_ref[...], preferred_element_type=jnp.float32)  # (1, U)
    logits_row = jnp.dot(qp * k_last, head_sel_ref[...],
                         preferred_element_type=jnp.float32) * scale   # (1, 128)
    return gst, logits_row


def _fused_concat_gst_kernel(x_ref, tokens_ref, wq_ref, wk_ref, wv_ref, query_ref,
                             amp_sel_ref, last_sel_ref, head_sel_ref,
                             o_ref, gst_ref, logits_ref):
    rows, D = x_ref.shape
    U = wv_ref.shape[1]
    gst, logits_row = _gst_core(tokens_ref, wq_ref, wk_ref, wv_ref, query_ref,
                                amp_sel_ref, last_sel_ref, head_sel_ref)
    if D % 128 == 0:
        # lane-aligned two-part store (unmasked vst on both halves)
        o_ref[:, pl.ds(0, D)] = x_ref[...].astype(o_ref.dtype)
        o_ref[:, pl.ds(D, U)] = jnp.broadcast_to(gst, (rows, U)).astype(o_ref.dtype)
    else:
        # non-128-aligned D: single concatenated store avoids two masked stores
        o_ref[...] = jnp.concatenate(
            [x_ref[...], jnp.broadcast_to(gst, (rows, U))], axis=-1).astype(o_ref.dtype)
    gst_ref[...] = jnp.broadcast_to(gst, gst_ref.shape)
    logits_ref[...] = jnp.broadcast_to(logits_row, logits_ref.shape)


def _fused_add_gst_kernel(x_ref, tokens_ref, wq_ref, wk_ref, wv_ref, query_ref,
                          amp_sel_ref, last_sel_ref, head_sel_ref,
                          o_ref, gst_ref, logits_ref):
    gst, logits_row = _gst_core(tokens_ref, wq_ref, wk_ref, wv_ref, query_ref,
                                amp_sel_ref, last_sel_ref, head_sel_ref)
    o_ref[...] = (x_ref[...] + jnp.broadcast_to(gst, x_ref.shape)).astype(o_ref.dtype)
    gst_ref[...] = jnp.broadcast_to(gst, gst_ref.shape)
    logits_ref[...] = jnp.broadcast_to(logits_row, logits_ref.shape)


# ---------------------------------------------------------------------------
# compute_gst (dict-style branch of TacotronAbstract.compute_gst), fully fused:
# one pallas_call -> (concat/add output, gst vector, last-entry logits)
# ---------------------------------------------------------------------------
def compute_gst(inputs, style_dict, params, speaker_embedding=None,
                style_agg='concatenate', out_dtype=None):
    B, T, D = inputs.shape
    U = params['w_v'].shape[1]
    H = GST_NUM_HEADS
    n_tok = params['style_tokens'].shape[0]
    out_dtype = inputs.dtype if out_dtype is None else out_dtype

    query = jnp.zeros((1, params['w_q'].shape[0]), jnp.float32)
    if speaker_embedding is not None:
        # TODO(synk): speaker-conditioned query requires a w_q of width
        # QUERY_DIM + speaker_dim; demo initializes w_q for the speaker-less query only.
        query = jnp.concatenate([query, speaker_embedding.reshape(1, -1)], axis=-1)

    # host-built selection constants (the style dict is Python data, not traced)
    token_ids = [int(k) for k in style_dict.keys()]
    amps = [float(v) for v in style_dict.values()]
    amp_sel = np.zeros((1, n_tok), np.float32)
    last_sel = np.zeros((1, n_tok), np.float32)
    for tid, a in zip(token_ids, amps):
        amp_sel[0, tid] += a
    last_sel[0, token_ids[-1]] = 1.0
    dh = U // H
    # lane-dense head reducer: column h (< H) sums that head's dims; rest zero
    head_sel = (np.arange(U)[:, None] // dh ==
                np.arange(128)[None, :]).astype(np.float32)            # (U, 128)

    rows = B * T
    x2 = inputs.reshape(rows, D)
    blk = _row_block(rows)
    G = pl.cdiv(rows, blk)
    if style_agg == 'concatenate':
        out_D = D + U
        kernel = _fused_concat_gst_kernel
    else:
        assert D == U, "style_agg='add' requires encoder dim == gst_embedding_dim"
        out_D = D
        kernel = _fused_add_gst_kernel

    working_set = 4 * blk * (D + out_D) * 2  # double-buffered x + out tiles (f32)
    out2, gst_rows, logits_rows = pl.pallas_call(
        kernel,
        out_shape=(jax.ShapeDtypeStruct((rows, out_D), out_dtype),
                   jax.ShapeDtypeStruct((G * 8, U), jnp.float32),
                   jax.ShapeDtypeStruct((G * 8, 128), jnp.float32)),
        grid=(G,),
        in_specs=[pl.BlockSpec((blk, D), lambda i: (i, 0)),
                  _const_spec(params['style_tokens']),
                  _const_spec(params['w_q']),
                  _const_spec(params['w_k']),
                  _const_spec(params['w_v']),
                  _const_spec(query),
                  _const_spec(amp_sel),
                  _const_spec(last_sel),
                  _const_spec(head_sel)],
        out_specs=(pl.BlockSpec((blk, out_D), lambda i: (i, 0)),
                   pl.BlockSpec((8, U), lambda i: (i, 0)),
                   pl.BlockSpec((8, 128), lambda i: (i, 0))),
        compiler_params=_compiler_params(working_set),
    )(x2, params['style_tokens'], params['w_q'], params['w_k'], params['w_v'],
      query, jnp.asarray(amp_sel), jnp.asarray(last_sel), jnp.asarray(head_sel))

    out = out2.reshape(B, T, out_D)
    gst_outputs = gst_rows[0:1, :].reshape(1, 1, U)
    logits = logits_rows[0:1, :H]          # torch keeps only the LAST attention's logits
    return out, gst_outputs, logits


# ---------------------------------------------------------------------------
# _concat_speaker_embedding / _add_speaker_embedding (standalone module methods)
# tiled over flattened (B*T) rows, full feature width (lane-dense blocks)
# ---------------------------------------------------------------------------
def _concat_rows_kernel(x_ref, g_ref, o_ref):
    rows, D = x_ref.shape
    U = g_ref.shape[1]
    if D % 128 == 0:
        o_ref[:, pl.ds(0, D)] = x_ref[...].astype(o_ref.dtype)
        o_ref[:, pl.ds(D, U)] = jnp.broadcast_to(g_ref[...], (rows, U)).astype(o_ref.dtype)
    else:
        o_ref[...] = jnp.concatenate(
            [x_ref[...], jnp.broadcast_to(g_ref[...], (rows, U))], axis=-1).astype(o_ref.dtype)


def _add_rows_kernel(x_ref, g_ref, o_ref):
    o_ref[...] = (x_ref[...] + jnp.broadcast_to(g_ref[...], x_ref.shape)).astype(o_ref.dtype)


def concat_speaker_embedding(outputs, speaker_embeddings, out_dtype=None):
    B, T, D = outputs.shape
    U = speaker_embeddings.shape[-1]
    out_dtype = outputs.dtype if out_dtype is None else out_dtype
    rows = B * T
    x2 = outputs.reshape(rows, D)
    g2 = speaker_embeddings.reshape(1, U)
    blk = _row_block(rows)
    out2 = pl.pallas_call(
        _concat_rows_kernel,
        out_shape=jax.ShapeDtypeStruct((rows, D + U), out_dtype),
        grid=(pl.cdiv(rows, blk),),
        in_specs=[pl.BlockSpec((blk, D), lambda i: (i, 0)),
                  pl.BlockSpec((1, U), lambda i: (0, 0))],
        out_specs=pl.BlockSpec((blk, D + U), lambda i: (i, 0)),
        compiler_params=_compiler_params(4 * blk * (2 * D + U) * 2),
    )(x2, g2)
    return out2.reshape(B, T, D + U)


def add_speaker_embedding(outputs, speaker_embeddings, out_dtype=None):
    B, T, D = outputs.shape
    out_dtype = outputs.dtype if out_dtype is None else out_dtype
    rows = B * T
    x2 = outputs.reshape(rows, D)
    g2 = speaker_embeddings.reshape(1, D)
    blk = _row_block(rows)
    out2 = pl.pallas_call(
        _add_rows_kernel,
        out_shape=jax.ShapeDtypeStruct((rows, D), out_dtype),
        grid=(pl.cdiv(rows, blk),),
        in_specs=[pl.BlockSpec((blk, D), lambda i: (i, 0)),
                  pl.BlockSpec((1, D), lambda i: (0, 0))],
        out_specs=pl.BlockSpec((blk, D), lambda i: (i, 0)),
        compiler_params=_compiler_params(4 * blk * 2 * D * 2),
    )(x2, g2)
    return out2.reshape(B, T, D)


# ---------------------------------------------------------------------------
# compute_masks: BOTH masks from a single gridless pallas_call.
# Rows = stacked [text_lengths ; mel_lengths], padded to 32 (int8 sublane
# packing); cols padded to 128 (lane-dense unmasked stores).
# ---------------------------------------------------------------------------
def _sequence_mask_kernel(len_ref, mask_ref):
    rows, cols = mask_ref.shape
    ids = jax.lax.broadcasted_iota(jnp.int32, (rows, cols), 1)
    mask_ref[...] = (ids < len_ref[...]).astype(jnp.int8)


def compute_masks(text_lengths, mel_lengths=None, r=DECODER_R,
                  max_text_len=None, max_mel_len=None):
    # Pass max_*_len as static ints in hot loops (jit-compatible, no host sync);
    # the fallback mirrors torch's `.max()` semantics.
    if max_text_len is None:
        max_text_len = int(jax.device_get(jnp.max(text_lengths)))
    max_text_len = int(max_text_len)
    B = int(text_lengths.shape[0])
    lens = [text_lengths.astype(jnp.int32)]
    max_cols = max_text_len

    if mel_lengths is not None:
        if max_mel_len is None:
            max_mel_len = int(jax.device_get(jnp.max(mel_lengths)))
        max_mel_len = int(max_mel_len)
        if max_mel_len % r > 0:
            max_mel_len = max_mel_len + (r - max_mel_len % r)
        lens.append(mel_lengths.astype(jnp.int32))
        max_cols = max(max_cols, max_mel_len)

    all_lens = jnp.concatenate(lens)
    R = int(all_lens.shape[0])
    R_pad = _round_up(max(R, 32), 32)           # int8 packs 32 sublanes / vreg
    L_pad = _round_up(max(max_cols, 128), 128)  # lane-dense
    len_col = jnp.zeros((R_pad, 1), jnp.int32).at[:R, 0].set(all_lens)

    mask_i8 = pl.pallas_call(
        _sequence_mask_kernel,
        out_shape=jax.ShapeDtypeStruct((R_pad, L_pad), jnp.int8),
        in_specs=[_VMEM],
        out_specs=_VMEM,
    )(len_col)

    input_mask = mask_i8[:B, :max_text_len].astype(jnp.bool_)
    output_mask = None
    if mel_lengths is not None:
        Bm = int(mel_lengths.shape[0])
        output_mask = mask_i8[B:B + Bm, :max_mel_len].astype(jnp.bool_)
    return input_mask, output_mask


# ---------------------------------------------------------------------------
if __name__ == "__main__":
    key = jax.random.PRNGKey(0)
    k_tok, k_q, k_k, k_v, k_in, k_spk = jax.random.split(key, 6)
    params = {
        'style_tokens': jax.random.normal(k_tok, (GST_STYLE_TOKENS, KEY_DIM), jnp.float32) * 0.5,
        'w_q': jax.random.normal(k_q, (QUERY_DIM, GST_EMBEDDING_DIM), jnp.float32) * 0.02,
        'w_k': jax.random.normal(k_k, (KEY_DIM, GST_EMBEDDING_DIM), jnp.float32) * 0.02,
        'w_v': jax.random.normal(k_v, (KEY_DIM, GST_EMBEDDING_DIM), jnp.float32) * 0.02,
    }
    B, T = 2, 8
    encoder_outputs = jax.random.normal(k_in, (B, T, ENCODER_DIM), jnp.float32)
    style_dict = {'0': 0.3, '3': 0.7}

    # fused GST + concat / add paths
    out, gst_outputs, logits = compute_gst(encoder_outputs, style_dict, params,
                                           style_agg='concatenate')
    out_add, gst_outputs_add, _ = compute_gst(encoder_outputs, style_dict, params,
                                              style_agg='add')

    # standalone speaker-embedding helpers
    spk = jax.random.normal(k_spk, (1, 1, 128), jnp.float32)
    cat_spk = concat_speaker_embedding(encoder_outputs, spk)
    add_spk = add_speaker_embedding(encoder_outputs, spk)

    # masks (both from one kernel launch)
    text_lengths = jnp.array([5, 8], jnp.int32)
    mel_lengths = jnp.array([12, 15], jnp.int32)
    input_mask, output_mask = compute_masks(text_lengths, mel_lengths, r=DECODER_R,
                                            max_text_len=8, max_mel_len=15)

    jax.block_until_ready((out, gst_outputs, logits, out_add, gst_outputs_add,
                           cat_spk, add_spk, input_mask, output_mask))

    # --- pure-JAX reference checks ---
    ref_gst = jnp.zeros((GST_EMBEDDING_DIM,), jnp.float32)
    for k_token, amp in style_dict.items():
        tok = jnp.tanh(params['style_tokens'][int(k_token)])
        # softmax over a single key position == 1 for every head -> attn out == V proj
        ref_gst = ref_gst + amp * (tok @ params['w_v'])
    assert jnp.allclose(gst_outputs[0, 0], ref_gst, atol=1e-4), "gst mismatch"
    assert jnp.allclose(gst_outputs_add[0, 0], ref_gst, atol=1e-4), "gst (add path) mismatch"

    assert out.shape == (B, T, ENCODER_DIM + GST_EMBEDDING_DIM)
    assert jnp.allclose(out[..., :ENCODER_DIM], encoder_outputs)
    assert jnp.allclose(out[..., ENCODER_DIM:],
                        jnp.broadcast_to(gst_outputs, (B, T, GST_EMBEDDING_DIM)))
    assert jnp.allclose(out_add, encoder_outputs + gst_outputs)

    # logits reference (last dict entry, zero query -> zeros)
    q0 = jnp.zeros((1, QUERY_DIM), jnp.float32)
    qp = q0 @ params['w_q']
    k_last = jnp.tanh(params['style_tokens'][3]) @ params['w_k']
    ref_logits = (qp * k_last).reshape(GST_NUM_HEADS, -1).sum(-1) / math.sqrt(
        GST_EMBEDDING_DIM // GST_NUM_HEADS)
    assert logits.shape == (1, GST_NUM_HEADS)
    assert jnp.allclose(logits[0], ref_logits, atol=1e-4), "logits mismatch"

    # speaker-embedding helper checks
    assert jnp.allclose(cat_spk[..., :ENCODER_DIM], encoder_outputs)
    assert jnp.allclose(cat_spk[..., ENCODER_DIM:], jnp.broadcast_to(spk, (B, T, 128)))
    assert jnp.allclose(add_spk, encoder_outputs + spk)

    # mask checks (mel max_len 15 -> 16 with r=2)
    assert input_mask.shape == (2, 8) and output_mask.shape == (2, 16)
    assert bool(input_mask[0, 4]) and not bool(input_mask[0, 5])
    assert bool(output_mask[0, 11]) and not bool(output_mask[0, 12])

    print("KERNEL_OK")
</pallas_src>

<mosaic_0001>
module attributes {stable_mosaic.version = 11 : i64} {
  func.func @_fused_concat_gst_kernel(%arg0: i32, %arg1: memref<8x128xf32, #tpu.memory_space<vmem>>, %arg2: memref<10x32xf32, #tpu.memory_space<vmem>>, %arg3: memref<64x128xf32, #tpu.memory_space<vmem>>, %arg4: memref<32x128xf32, #tpu.memory_space<vmem>>, %arg5: memref<32x128xf32, #tpu.memory_space<vmem>>, %arg6: memref<1x64xf32, #tpu.memory_space<vmem>>, %arg7: memref<1x10xf32, #tpu.memory_space<vmem>>, %arg8: memref<1x10xf32, #tpu.memory_space<vmem>>, %arg9: memref<128x128xf32, #tpu.memory_space<vmem>>, %arg10: memref<8x256xf32, #tpu.memory_space<vmem>>, %arg11: memref<8x128xf32, #tpu.memory_space<vmem>>, %arg12: memref<8x128xf32, #tpu.memory_space<vmem>>) attributes {dimension_semantics = [#tpu.dimension_semantics<parallel>], iteration_bounds = array<i64: 2>, scalar_prefetch = 0 : i64, scratch_operands = 0 : i64, tpu.core_type = #tpu.core_type<tc>, window_params = [{transform_indices = @transform_0, window_bounds = array<i64: 8, 128>}, {pipeline_mode = #tpu.pipeline_mode<synchronous>, transform_indices = @transform_1, window_bounds = array<i64: 10, 32>}, {pipeline_mode = #tpu.pipeline_mode<synchronous>, transform_indices = @transform_2, window_bounds = array<i64: 64, 128>}, {pipeline_mode = #tpu.pipeline_mode<synchronous>, transform_indices = @transform_3, window_bounds = array<i64: 32, 128>}, {pipeline_mode = #tpu.pipeline_mode<synchronous>, transform_indices = @transform_4, window_bounds = array<i64: 32, 128>}, {pipeline_mode = #tpu.pipeline_mode<synchronous>, transform_indices = @transform_5, window_bounds = array<i64: 1, 64>}, {pipeline_mode = #tpu.pipeline_mode<synchronous>, transform_indices = @transform_6, window_bounds = array<i64: 1, 10>}, {pipeline_mode = #tpu.pipeline_mode<synchronous>, transform_indices = @transform_7, window_bounds = array<i64: 1, 10>}, {pipeline_mode = #tpu.pipeline_mode<synchronous>, transform_indices = @transform_8, window_bounds = array<i64: 128, 128>}, {transform_indices = @transform_9, window_bounds = array<i64: 8, 256>}, {transform_indices = @transform_10, window_bounds = array<i64: 8, 128>}, {transform_indices = @transform_11, window_bounds = array<i64: 8, 128>}]} {
    %c0 = arith.constant 0 : index
    %c0_0 = arith.constant 0 : index
    %0 = vector.load %arg2[%c0, %c0_0] : memref<10x32xf32, #tpu.memory_space<vmem>>, vector<10x32xf32>
    %1 = math.tanh %0 : vector<10x32xf32>
    %c0_1 = arith.constant 0 : index
    %c0_2 = arith.constant 0 : index
    %2 = vector.load %arg7[%c0_1, %c0_2] : memref<1x10xf32, #tpu.memory_space<vmem>>, vector<1x10xf32>
    %cst = arith.constant dense<0.000000e+00> : vector<1x32xf32>
    %3 = tpu.matmul %2, %1, %cst {dimension_numbers = #tpu.dot_dimension_numbers<[1], [0], [0], [1], [0, 0, 1, 1], [], []>} : vector<1x10xf32>, vector<10x32xf32>, vector<1x32xf32> -> vector<1x32xf32>
    %c0_3 = arith.constant 0 : index
    %c0_4 = arith.constant 0 : index
    %4 = vector.load %arg5[%c0_3, %c0_4] : memref<32x128xf32, #tpu.memory_space<vmem>>, vector<32x128xf32>
    %cst_5 = arith.constant dense<0.000000e+00> : vector<1x128xf32>
    %5 = tpu.matmul %3, %4, %cst_5 {dimension_numbers = #tpu.dot_dimension_numbers<[1], [0], [0], [1], [0, 0, 1, 1], [], []>} : vector<1x32xf32>, vector<32x128xf32>, vector<1x128xf32> -> vector<1x128xf32>
    %c0_6 = arith.constant 0 : index
    %c0_7 = arith.constant 0 : index
    %6 = vector.load %arg6[%c0_6, %c0_7] : memref<1x64xf32, #tpu.memory_space<vmem>>, vector<1x64xf32>
    %c0_8 = arith.constant 0 : index
    %c0_9 = arith.constant 0 : index
    %7 = vector.load %arg3[%c0_8, %c0_9] : memref<64x128xf32, #tpu.memory_space<vmem>>, vector<64x128xf32>
    %cst_10 = arith.constant dense<0.000000e+00> : vector<1x128xf32>
    %8 = tpu.matmul %6, %7, %cst_10 {dimension_numbers = #tpu.dot_dimension_numbers<[1], [0], [0], [1], [0, 0, 1, 1], [], []>} : vector<1x64xf32>, vector<64x128xf32>, vector<1x128xf32> -> vector<1x128xf32>
    %c0_11 = arith.constant 0 : index
    %c0_12 = arith.constant 0 : index
    %9 = vector.load %arg8[%c0_11, %c0_12] : memref<1x10xf32, #tpu.memory_space<vmem>>, vector<1x10xf32>
    %cst_13 = arith.constant dense<0.000000e+00> : vector<1x32xf32>
    %10 = tpu.matmul %9, %1, %cst_13 {dimension_numbers = #tpu.dot_dimension_numbers<[1], [0], [0], [1], [0, 0, 1, 1], [], []>} : vector<1x10xf32>, vector<10x32xf32>, vector<1x32xf32> -> vector<1x32xf32>
    %c0_14 = arith.constant 0 : index
    %c0_15 = arith.constant 0 : index
    %11 = vector.load %arg4[%c0_14, %c0_15] : memref<32x128xf32, #tpu.memory_space<vmem>>, vector<32x128xf32>
    %cst_16 = arith.constant dense<0.000000e+00> : vector<1x128xf32>
    %12 = tpu.matmul %10, %11, %cst_16 {dimension_numbers = #tpu.dot_dimension_numbers<[1], [0], [0], [1], [0, 0, 1, 1], [], []>} : vector<1x32xf32>, vector<32x128xf32>, vector<1x128xf32> -> vector<1x128xf32>
    %13 = arith.mulf %8, %12 : vector<1x128xf32>
    %c0_17 = arith.constant 0 : index
    %c0_18 = arith.constant 0 : index
    %14 = vector.load %arg9[%c0_17, %c0_18] : memref<128x128xf32, #tpu.memory_space<vmem>>, vector<128x128xf32>
    %cst_19 = arith.constant dense<0.000000e+00> : vector<1x128xf32>
    %15 = tpu.matmul %13, %14, %cst_19 {dimension_numbers = #tpu.dot_dimension_numbers<[1], [0], [0], [1], [0, 0, 1, 1], [], []>} : vector<1x128xf32>, vector<128x128xf32>, vector<1x128xf32> -> vector<1x128xf32>
    %cst_20 = arith.constant 0.176776692 : f32
    %16 = vector.broadcast %cst_20 : f32 to vector<1x128xf32>
    %17 = arith.mulf %15, %16 : vector<1x128xf32>
    %c0_21 = arith.constant 0 : index
    %c0_22 = arith.constant 0 : index
    %18 = vector.load %arg1[%c0_21, %c0_22] : memref<8x128xf32, #tpu.memory_space<vmem>>, vector<8x128xf32>
    %c0_23 = arith.constant 0 : index
    %c0_24 = arith.constant 0 : index
    %19 = vector.load %arg10[%c0_23, %c0_24] : memref<8x256xf32, #tpu.memory_space<vmem>>, vector<8x128xf32>
    tpu.vector_store %arg10[%c0_23, %c0_24], %18 {strides = array<i32>} : memref<8x256xf32, #tpu.memory_space<vmem>>, vector<8x128xf32>,
    %20 = vector.shape_cast %5 : vector<1x128xf32> to vector<1x128xf32>
    %21 = vector.broadcast %20 : vector<1x128xf32> to vector<8x128xf32>
    %c0_25 = arith.constant 0 : index
    %c128 = arith.constant 128 : index
    %22 = vector.load %arg10[%c0_25, %c128] : memref<8x256xf32, #tpu.memory_space<vmem>>, vector<8x128xf32>
    tpu.vector_store %arg10[%c0_25, %c128], %21 {strides = array<i32>} : memref<8x256xf32, #tpu.memory_space<vmem>>, vector<8x128xf32>,
    %23 = vector.shape_cast %5 : vector<1x128xf32> to vector<1x128xf32>
    %24 = vector.broadcast %23 : vector<1x128xf32> to vector<8x128xf32>
    %c0_26 = arith.constant 0 : index
    %c0_27 = arith.constant 0 : index
    %25 = vector.load %arg11[%c0_26, %c0_27] : memref<8x128xf32, #tpu.memory_space<vmem>>, vector<8x128xf32>
    tpu.vector_store %arg11[%c0_26, %c0_27], %24 {strides = array<i32>} : memref<8x128xf32, #tpu.memory_space<vmem>>, vector<8x128xf32>,
    %26 = vector.shape_cast %17 : vector<1x128xf32> to vector<1x128xf32>
    %27 = vector.broadcast %26 : vector<1x128xf32> to vector<8x128xf32>
    %c0_28 = arith.constant 0 : index
    %c0_29 = arith.constant 0 : index
    %28 = vector.load %arg12[%c0_28, %c0_29] : memref<8x128xf32, #tpu.memory_space<vmem>>, vector<8x128xf32>
    tpu.vector_store %arg12[%c0_28, %c0_29], %27 {strides = array<i32>} : memref<8x128xf32, #tpu.memory_space<vmem>>, vector<8x128xf32>,
    return
  }
  func.func @transform_0(%arg0: i32) -> (i32, i32) {
    %c0_i32 = arith.constant 0 : i32
    %c0_i32_0 = arith.constant 0 : i32
    return %arg0, %c0_i32 : i32, i32
  }
  func.func @transform_1(%arg0: i32) -> (i32, i32) {
    %c0_i32 = arith.constant 0 : i32
    %c0_i32_0 = arith.constant 0 : i32
    %c0_i32_1 = arith.constant 0 : i32
    return %c0_i32, %c0_i32_0 : i32, i32
  }
  func.func @transform_2(%arg0: i32) -> (i32, i32) {
    %c0_i32 = arith.constant 0 : i32
    %c0_i32_0 = arith.constant 0 : i32
    %c0_i32_1 = arith.constant 0 : i32
    return %c0_i32, %c0_i32_0 : i32, i32
  }
  func.func @transform_3(%arg0: i32) -> (i32, i32) {
    %c0_i32 = arith.constant 0 : i32
    %c0_i32_0 = arith.constant 0 : i32
    %c0_i32_1 = arith.constant 0 : i32
    return %c0_i32, %c0_i32_0 : i32, i32
  }
  func.func @transform_4(%arg0: i32) -> (i32, i32) {
    %c0_i32 = arith.constant 0 : i32
    %c0_i32_0 = arith.constant 0 : i32
    %c0_i32_1 = arith.constant 0 : i32
    return %c0_i32, %c0_i32_0 : i32, i32
  }
  func.func @transform_5(%arg0: i32) -> (i32, i32) {
    %c0_i32 = arith.constant 0 : i32
    %c0_i32_0 = arith.constant 0 : i32
    %c0_i32_1 = arith.constant 0 : i32
    return %c0_i32, %c0_i32_0 : i32, i32
  }
  func.func @transform_6(%arg0: i32) -> (i32, i32) {
    %c0_i32 = arith.constant 0 : i32
    %c0_i32_0 = arith.constant 0 : i32
    %c0_i32_1 = arith.constant 0 : i32
    return %c0_i32, %c0_i32_0 : i32, i32
  }
  func.func @transform_7(%arg0: i32) -> (i32, i32) {
    %c0_i32 = arith.constant 0 : i32
    %c0_i32_0 = arith.constant 0 : i32
    %c0_i32_1 = arith.constant 0 : i32
    return %c0_i32, %c0_i32_0 : i32, i32
  }
  func.func @transform_8(%arg0: i32) -> (i32, i32) {
    %c0_i32 = arith.constant 0 : i32
    %c0_i32_0 = arith.constant 0 : i32
    %c0_i32_1 = arith.constant 0 : i32
    return %c0_i32, %c0_i32_0 : i32, i32
  }
  func.func @transform_9(%arg0: i32) -> (i32, i32) {
    %c0_i32 = arith.constant 0 : i32
    %c0_i32_0 = arith.constant 0 : i32
    return %arg0, %c0_i32 : i32, i32
  }
  func.func @transform_10(%arg0: i32) -> (i32, i32) {
    %c0_i32 = arith.constant 0 : i32
    %c0_i32_0 = arith.constant 0 : i32
    return %arg0, %c0_i32 : i32, i32
  }
  func.func @transform_11(%arg0: i32) -> (i32, i32) {
    %c0_i32 = arith.constant 0 : i32
    %c0_i32_0 = arith.constant 0 : i32
    return %arg0, %c0_i32 : i32, i32
  }
}

</mosaic_0001>

<bundles_post_ra>
// kernel: tpu_custom_call.1
= control target key start
LH: loop header
LB: loop body
LE: loop exit
PB: predicated region body
PF: predicated region fallthrough
CT: control target
= control target key end

     0   :  { %s2224_s0 = inlined_call_operand.hbm [shape: f32[16,128], index: 0, kind: input, shape index: {}]   ;;  %s2225_s1 = inlined_call_operand.hbm [shape: f32[10,32], index: 1, kind: input, shape index: {}]   ;;  %s2226_s2 = inlined_call_operand.hbm [shape: f32[64,128], index: 2, kind: input, shape index: {}]   ;;  %s2227_s3 = inlined_call_operand.hbm [shape: f32[32,128], index: 3, kind: input, shape index: {}]   ;;  %s2228_s4 = inlined_call_operand.hbm [shape: f32[32,128], index: 4, kind: input, shape index: {}]   ;;  %s2229_s5 = inlined_call_operand.vmem [shape: f32[1,64], index: 5, kind: input, shape index: {}]   ;;  %s2230_s6 = inlined_call_operand.vmem [shape: f32[1,10], index: 6, kind: input, shape index: {}]   ;;  %s2231_s7 = inlined_call_operand.vmem [shape: f32[1,10], index: 7, kind: input, shape index: {}]   ;;  %s2232_s8 = inlined_call_operand.hbm [shape: f32[128,128], index: 8, kind: input, shape index: {}]   ;;  %s2233_s9 = inlined_call_operand.hbm [shape: f32[16,256], index: 9, kind: output, shape index: {0}]   ;;  %s2234_s10 = inlined_call_operand.hbm [shape: f32[16,128], index: 10, kind: output, shape index: {1}]   ;;  %s2235_s11 = inlined_call_operand.hbm [shape: f32[16,128], index: 11, kind: output, shape index: {2}]  }
   0x1   :  { %2242 = sst [smem:[#allocation24_spill]] %s2225_s1 }
   0x2   :  { %2243 = sst [smem:[#allocation25_spill]] %s2226_s2 }
   0x3   :  { %2244 = sst [smem:[#allocation26_spill]] %s2227_s3 }
   0x4   :  { %2245 = sst [smem:[#allocation27_spill]] %s2228_s4 }
   0x5   :  { %2246 = sst [smem:[#allocation28_spill]] %s2232_s8 }
   0x6   :  { %17 = vsyncpa [#allocation3], 0 }
   0x7   :  { %19 = vsyncpa [#allocation3 + $0x1], 0 }
   0x8   :  { %20 = vsyncpa [#allocation6], 0 }
   0x9   :  { %21 = vsyncpa [#allocation9], 0 }
   0xa   :  { %22 = vsyncpa [#allocation12], 0 }
   0xb   :  { %23 = vsyncpa [#allocation4], 0 }
   0xc   :  { %25 = vsyncpa [#allocation4 + $0x1], 0 }
   0xd   :  { %26 = vsyncpa [#allocation15], 0 }
   0xe   :  { %28 = vsyncpa [#allocation15 + $0x1], 0  ;;  %s1868_s17 = smov 0   ;;  %s1870_s18 = smov 0  }
   0xf   :  { %s1872_s19 = smov 0   ;;  %s1874_s20 = smov 0  }
  0x10 LB: > { %s1795_s21 = smov [#allocation5]   ;;  %s1889_s23 = sadd.s32 4294967295, %s1793_s20   ;;  %s1793_s20 = sphi %s1874_s20, %s2277_s20   ;;  %s1789_s19 = sphi %s1872_s19, %s2276_s19   ;;  %s1785_s18 = sphi %s1870_s18, %s2275_s18   ;;  %s1781_s17 = sphi %s1868_s17, %s2274_s17  }
  0x11   : > { %s323_s22 = sshll.u32 %s1795_s21, 4  ;;  %p1220_p0 = scmp.ge.s32.totalorder %s1793_s20, 1  ;;  %s324_s22 = int_to_ptr.vmem [resolvable:$true] %s323_s22 }
  0x12   : > { %p2237_p1 = scmp.eq.s32.totalorder %s1889_s23, 0  ;;  %p311_p2 = scmp.lt.s32.totalorder %s1793_s20, 3 }
  0x13   : > { %s1796_s25 = smov [#allocation8]   ;;  %s1797_s28 = smov [#allocation7]  }
  0x14   : > { %p1894_p3 = pnand %p1220_p0, %p311_p2  ;;  %s349_s26 = sshll.u32 %s1796_s25, 4  ;;  %s1907_s26 = int_to_ptr.vmem [resolvable:$true] %s349_s26 }
  0x15   : > { %s336_s29 = sshll.u32 %s1797_s28, 4  ;;  %s1514_s12 = scalar_lea.vmem %s324_s22, 256  ;;  %s1909_s29 = int_to_ptr.vmem [resolvable:$true] %s336_s29 }
  0x16   : > { %s2247_s24 = scalar_select %p1894_p3, 1, 0 }
  0x17   : > { %p1416_p5 = pneg %p1894_p3  ;;  %p1515_p8 = scmp.ne.s32.totalorder %s324_s22, %s1514_s12 }
  0x18   : > { %p1522_p11 = scmp.lt.s32.totalorder %s324_s22, %s324_s22  ;;  %p1523_p12 = scmp.lt.s32.totalorder %s1514_s12, %s1514_s12 }
  0x19   : > { %p1903_p6 = pnand %p1416_p5, %p2237_p1 }
  0x1a   : > { %p1524_p13 = por %p1523_p12, %p1522_p11 }
  0x1b   : > { %p1913_p7 = pneg %p1903_p6 }
  0x1d   : > { %p1517_p9 = pnand %p1515_p8, %p1913_p7 }
  0x1f   : > { %p1518_p10 = pneg %p1517_p9 }
  0x21   : > { %p1525_p0 = pnand %p1524_p13, %p1518_p10 }
  0x23   : > { %1528 = shalt.err (!%p1525_p0)
}
  0x24   : > { %s1798_s13 = smov 128   ;;  %s1799_s14 = smov 8  }
  0x25   : > { %s2250_s1 = sld [smem:[#allocation24_spill]]  ;;  %s1540_s21 = scalar_lea.vmem %s1907_s26, 512 }
  0x26   : > { %p1541_p2 = scmp.ne.s32.totalorder %s1907_s26, %s1540_s21  ;;  %p1548_p9 = scmp.lt.s32.totalorder %s1907_s26, %s1907_s26 }
  0x27   : > { %p1549_p10 = scmp.lt.s32.totalorder %s1540_s21, %s1540_s21 }
  0x28   : > { %p1543_p5 = pnand %p1541_p2, %p1913_p7 }
  0x29   : > { %p1550_p11 = por %p1549_p10, %p1548_p9 }
  0x2a   : > { %p1544_p8 = pneg %p1543_p5 }
  0x2b   : > { %1419 = dma.hbm_to_vmem [thread:$0]  (!%p1903_p6), %s2250_s1, 256, %s324_s22, [#allocation6], %s1798_s13, %s1798_s13, %s1799_s14  }
  0x2c   : > { %p1551_p12 = pnand %p1550_p11, %p1544_p8 }
  0x2e   : > { %1554 = shalt.err (!%p1551_p12)
}
  0x2f   : > { %s2251_s3 = sld [smem:[#allocation26_spill]]  ;;  %s1566_s22 = scalar_lea.vmem %s1909_s29, 1024 }
  0x30   : > { %p1567_p13 = scmp.ne.s32.totalorder %s1909_s29, %s1566_s22  ;;  %p1574_p5 = scmp.lt.s32.totalorder %s1909_s29, %s1909_s29 }
  0x31   : > { %p1575_p8 = scmp.lt.s32.totalorder %s1566_s22, %s1566_s22 }
  0x32   : > { %p1569_p0 = pnand %p1567_p13, %p1913_p7 }
  0x33   : > { %p1576_p9 = por %p1575_p8, %p1574_p5 }
  0x34   : > { %p1570_p2 = pneg %p1569_p0 }
  0x35   : > { %1425 = dma.hbm_to_vmem [thread:$0]  (!%p1903_p6), %s2251_s3, 512, %s1907_s26, [#allocation9], %s1798_s13, %s1798_s13, %s1799_s14  }
  0x36   : > { %p1577_p10 = pnand %p1576_p9, %p1570_p2 }
  0x38   : > { %1580 = shalt.err (!%p1577_p10)
}
  0x39   : > { %s2252_s2 = sld [smem:[#allocation25_spill]]  ;;  %s1800_s26 = smov [#allocation10]  }
  0x3a   : > { %s362_s16 = sshll.u32 %s1800_s26, 4  ;;  %s1801_s21 = smov [#allocation11]   ;;  %s363_s16 = int_to_ptr.vmem [resolvable:$true] %s362_s16 }
  0x3b   : > { %s384_s25 = sshll.u32 %s1801_s21, 4  ;;  %s1592_s28 = scalar_lea.vmem %s363_s16, 512  ;;  %s385_s25 = int_to_ptr.vmem [resolvable:$true] %s384_s25 }
  0x3c   : > { %p1593_p11 = scmp.ne.s32.totalorder %s363_s16, %s1592_s28  ;;  %p1600_p0 = scmp.lt.s32.totalorder %s363_s16, %s363_s16 }
  0x3d   : > { %p1601_p2 = scmp.lt.s32.totalorder %s1592_s28, %s1592_s28 }
  0x3e   : > { %p1595_p12 = pnand %p1593_p11, %p1913_p7 }
  0x3f   : > { %1422 = dma.hbm_to_vmem [thread:$0]  (!%p1903_p6), %s2252_s2, 1024, %s1909_s29, [#allocation6], %s1798_s13, %s1798_s13, %s1799_s14  }
  0x40   : > { %p1596_p13 = pneg %p1595_p12  ;;  %p1602_p5 = por %p1601_p2, %p1600_p0 }
  0x42   : > { %p1603_p8 = pnand %p1602_p5, %p1596_p13 }
  0x44   : > { %1606 = shalt.err (!%p1603_p8)
}
  0x45   : > { %s2253_s4 = sld [smem:[#allocation27_spill]]  ;;  %s1618_s12 = scalar_lea.vmem %s385_s25, 2048 }
  0x46   : > { %p1619_p9 = scmp.ne.s32.totalorder %s385_s25, %s1618_s12  ;;  %p1626_p12 = scmp.lt.s32.totalorder %s385_s25, %s385_s25 }
  0x47   : > { %p1627_p0 = scmp.lt.s32.totalorder %s1618_s12, %s1618_s12 }
  0x48   : > { %p1621_p10 = pnand %p1619_p9, %p1913_p7 }
  0x49   : > { %p1628_p13 = por %p1627_p0, %p1626_p12 }
  0x4a   : > { %p1622_p11 = pneg %p1621_p10 }
  0x4b   : > { %1428 = dma.hbm_to_vmem [thread:$0]  (!%p1903_p6), %s2253_s4, 512, %s363_s16, [#allocation9], %s1798_s13, %s1798_s13, %s1799_s14  }
  0x4c   : > { %p1629_p2 = pnand %p1628_p13, %p1622_p11 }
  0x4e   : > { %1632 = shalt.err (!%p1629_p2)
}
  0x4f   : > { %s2254_s8 = sld [smem:[#allocation28_spill]]  ;;  %s2236_s27 = sadd.s32 4294967294, %s1793_s20  }
  0x50   : > { %s1979_s30 = sadd.s32 1, %s1793_s20   ;;  %s41_s16 = sadd.s32 1, %s1789_s19 }
  0x51   : > { %s38_s21 = ssub.s32 %s1793_s20, %s1979_s30  ;;  %p48_p7 = scmp.ne.s32.totalorder %s1789_s19, %s1785_s18 }
  0x52   : > { %p39_p5 = scmp.eq.s32.totalorder %s38_s21, 0  ;;  %p49_p8 = scmp.eq.s32.totalorder %s1793_s20, 0 }
  0x53   : > { %p54_p9 = scmp.ne.s32.totalorder %s1785_s18, %s1781_s17  ;;  %p246_p10 = scmp.eq.s32.totalorder %s1889_s23, 1 }
  0x54   : > { %s1991_s28 = scalar_select %p39_p5, %s1789_s19, %s41_s16  }
  0x55   : > { %1431 = dma.hbm_to_vmem [thread:$0]  (!%p1903_p6), %s2254_s8, 2048, %s385_s25, [#allocation12], %s1798_s13, %s1798_s13, %s1799_s14  }
  0x56   : > { %2255 = sst [smem:[#allocation23_spill]] %s1991_s28  ;;  %p50_p11 = por %p49_p8, %p48_p7 }
  0x57   : > { %p1995_p12 = por %p2237_p1, %p54_p9  ;;  %p1999_p6 = por %p246_p10, %p48_p7 }
  0x58   : > { %p252_p0 = scmp.eq.s32.totalorder %s2236_s27, 1  ;;  %p1451_p13 = scmp.lt.s32.totalorder %s1793_s20, 2 }
  0x59   : > { %s2256_s29 = scalar_select %p1995_p12, 1, 0 }
  0x5a   : > { %s2257_s13 = scalar_select %p1999_p6, 1, 0 }
  0x5b   : > { %s398_s14 = sand.u32 1, %s1789_s19   ;;  %p2007_p2 = por %p252_p0, %p54_p9 }
  0x5c   : > { %s1227_s22 = sshll.u32 %s398_s14, 3  ;;  %s1228_s12 = sshll.u32 %s1793_s20, 7 }
  0x5d   : > { %s2258_s25 = scalar_select %p2007_p2, 1, 0 }
  0x5e   : > { %s2015_s16 = scalar_lea.hbm %s2224_s0, %s1228_s12  ;;  %s402_s21 = scalar_lea.vmem [#allocation2], %s1227_s22 }
  0x5f   : > { %s409_s1 = sshll.u32 %s402_s21, 4  ;;  %p2017_p7 = pnand %p1451_p13, %p50_p11  ;;  %s410_s1 = int_to_ptr.vmem [resolvable:$true] %s409_s1 }
  0x60   : > { %s399_s2 = scalar_lea.sflag [#allocation3], %s398_s14  ;;  %s1633_s3 = scalar_lea.hbm %s2015_s16, 128 }
  0x61   : > { %p1634_p5 = scmp.ne.s32.totalorder %s2015_s16, %s1633_s3  ;;  %p1635_p8 = pneg %p2017_p7 }
  0x62   : > { %s1638_s26 = scalar_lea.hbm %s2224_s0, 256  ;;  %p1639_p11 = scmp.lt.s32.totalorder %s2015_s16, %s2224_s0 }
  0x63   : > { %p1636_p9 = pnand %p1635_p8, %p1634_p5  ;;  %p1640_p0 = scmp.lt.s32.totalorder %s1638_s26, %s1633_s3 }
  0x65   : > { %p1637_p10 = pneg %p1636_p9  ;;  %p1641_p13 = por %p1640_p0, %p1639_p11 }
  0x67   : > { %p1642_p4 = pnand %p1641_p13, %p1637_p10 }
  0x69   : > { %1645 = shalt.err (!%p1642_p4)
}
  0x6a   : > { %s1646_s21 = scalar_lea.vmem %s410_s1, 128  ;;  %s1802_s14 = smov [#allocation2]  }
  0x6b   : > { %p1647_p1 = scmp.ne.s32.totalorder %s410_s1, %s1646_s21  ;;  %s1651_s8 = sshll.u32 %s1802_s14, 4  ;;  %s1652_s8 = int_to_ptr.vmem [resolvable:$false] %s1651_s8 }
  0x6c   : > { %s1653_s28 = scalar_lea.vmem %s1652_s8, 256  ;;  %p1654_p5 = scmp.lt.s32.totalorder %s410_s1, %s1652_s8 }
  0x6d   : > { %p1649_p2 = pnand %p1647_p1, %p1635_p8  ;;  %p1655_p9 = scmp.lt.s32.totalorder %s1653_s28, %s1646_s21 }
  0x6f   : > { %p1650_p6 = pneg %p1649_p2  ;;  %p1656_p12 = por %p1655_p9, %p1654_p5 }
  0x71   : > { %p1657_p3 = pnand %p1656_p12, %p1650_p6 }
  0x73   : > { %1660 = shalt.err (!%p1657_p3)
}
  0x74   : > { %1435 = dma.hbm_to_vmem [thread:$0]  (!%p2017_p7), %s2015_s16, 128, %s410_s1, %s399_s2  }
  0x75   : > { %p2260_p10 = scmp.ne.s32.totalorder %s2247_s24, 0 }
  0x76   : > { %s2038_s3 = sand.u32 (!%p2260_p10), 1, %s1785_s18   ;;  %p2261_p1 = scmp.ne.s32.totalorder (!%p2260_p10), %s2256_s29, 0 }
  0x77   : > { %418 = sbr.rel (%p2260_p10) target bundleno = 963 (0x3c3), region = 56  ;;  %s2041_s4 = sshll.u32 (!%p2260_p10), %s2038_s3, 3 }
  0x78   : > { %s421_s8 = scalar_lea.sflag (!%p2260_p10), [#allocation3], %s2038_s3  ;;  %s424_s28 = scalar_lea.vmem (!%p2260_p10), [#allocation2], %s2041_s4 }
  0x7c   : > { %1756 = dma.done.wait (%p2261_p1), %s421_s8, 128  }
  0x7d   : > { %1758 = vsyncadd (%p2261_p1), %s421_s8, 4294967168  ;;  %p2262_p3 = scmp.eq.s32.totalorder %s1889_s23, 0 }
  0x7f   : > { %1760 = dma.done.wait (%p2262_p3), [#allocation6], 1280   ;;  %p2263_p4 = pmov %p2262_p3 }
  0x80   : > { %p2264_p12 = pmov %p2262_p3 }
  0x81   : > { %1762 = vsyncadd (%p2263_p4), [#allocation6], 4294966016 }
  0x82   : > { %1764 = dma.done.wait (%p2264_p12), [#allocation9], 1024   ;;  %p2265_p6 = pmov %p2262_p3 }
  0x83   : > { %p2266_p2 = pmov %p2262_p3 }
  0x84   : > { %1766 = vsyncadd (%p2265_p6), [#allocation9], 4294966272 }
  0x85   : > { %1768 = dma.done.wait (%p2266_p2), [#allocation12], 2048   ;;  %p2267_p7 = pmov %p2266_p2 }
  0x86   : > { %v1803_v0 = vmov 0.0   ;;  %vm1804_vm0 = vmmov 0   ;;  %v494_v1 = vld [vmem:[#allocation5 + $0x8] sm:$0x3]  ;;  %v493_v2 = vld [vmem:[#allocation5] sm:$0xff]  ;;  %v577_v5 = vld [vmem:[#allocation10 + $0x8] sm:$0xff]  ;;  %v978_v40 = vlaneseq }
  0x87   : > { %1770 = vsyncadd (%p2267_p7), [#allocation12], 4294965248  ;;  %1298 = vmatprep.subr.mxu0 %v1803_v0  ;;  %1302 = vmatprep.mubr.msk.f32.mxu0 %vm1804_vm0, %v1803_v0  ;;  %1499 = vtanh.f32 %v494_v1  ;;  %v579_v3 = vld [vmem:[#allocation10 + $0x18] sm:$0xff]  ;;  %v578_v4 = vld [vmem:[#allocation10 + $0x10] sm:$0xff]  ;;  %vm502_vm1 = vcmask 1041408   ;;  %vm498_vm2 = vcmask 80896  }
  0x88   : > { %1305 = vmatprep.subr.mxu1 %v1803_v0  ;;  %1313 = vmatprep.mubr.msk.f32.mxu1 %vm1804_vm0, %v1803_v0  ;;  %1501 = vtanh.f32 %v493_v2  ;;  %v576_v6 = vld [vmem:[#allocation10] sm:$0xff]  ;;  %vm580_vm3 = vcmask 261120   ;;  %v662_v10 = vld [vmem:[#allocation7 + $0x38] sm:$0xff]  ;;  %v661_v12 = vld [vmem:[#allocation7 + $0x30] sm:$0xff]  ;;  %vm663_vm4 = vcmask 523264   ;;  %v2122_v41 = vshrl.u32 %v978_v40, 7 }
  0x89   : > { %1306 = vmatpush3.msra.mxu1 %v579_v3  ;;  %v497_v9 = vld [vmem:[%s2230_s6] sm:$0x1]  ;;  %v660_v14 = vld [vmem:[#allocation7 + $0x28] sm:$0xff]  ;;  %v658_v16 = vld [vmem:[#allocation7 + $0x18] sm:$0xff]  ;;  %s1236_s12 = sshll.u32 %s2038_s3, 4  ;;  %s485_s26 = scalar_lea.vmem [#allocation14], %s2041_s4 }
  0x8a   : > { %1307 = vmatprep.subr.mxu1 %v1803_v0  ;;  %v659_v15 = vld [vmem:[#allocation7 + $0x20] sm:$0xff]  ;;  %v657_v17 = vld [vmem:[#allocation7 + $0x10] sm:$0xff]  ;;  %v656_v18 = vld [vmem:[#allocation7 + $0x8] sm:$0xff]  ;;  %v980_v42 = vsub.s32 0, %v2122_v41  ;;  %s2128_s15 = scalar_lea.vmem [#allocation13], %s1236_s12  ;;  %s994_s22 = sand.u32 1, %s1889_s23  }
  0x8b   : > { %1308 = vmatpush3.msra.mxu1 %v578_v4  ;;  %v655_v19 = vld [vmem:[#allocation7] sm:$0xff]  ;;  %v814_v22 = vld [vmem:[#allocation8 + $0x18] sm:$0xff]  ;;  %v813_v23 = vld [vmem:[#allocation8 + $0x10] sm:$0xff]  ;;  %s2241_s21 = sshll.u32 %s1889_s23, 7  ;;  %s1027_s2 = sshll.u32 %s485_s26, 4  ;;  %s1028_s2 = int_to_ptr.vmem [resolvable:$true] %s1027_s2 }
  0x8c   : > { %1309 = vmatprep.subr.mxu1 %v1803_v0  ;;  %v654_v20 = vld [vmem:[%s2229_s5] sm:$0x1]  ;;  %v812_v24 = vld [vmem:[#allocation8 + $0x8] sm:$0xff]  ;;  %v904_v26 = vld [vmem:[#allocation11 + $0x78] sm:$0xff]  ;;  %s2141_s1 = scalar_lea.hbm %s2234_s10, %s2241_s21  ;;  %s2146_s24 = scalar_lea.sflag [#allocation15], %s994_s22 }
  0x8d   : > { %1310 = vmatpush3.msra.mxu1 %v577_v5  ;;  %v737_v21 = vld [vmem:[%s2231_s7] sm:$0x1]  ;;  %v903_v27 = vld [vmem:[#allocation11 + $0x70] sm:$0xff]  ;;  %v902_v28 = vld [vmem:[#allocation11 + $0x68] sm:$0xff]  ;;  %s1661_s27 = scalar_lea.vmem %s1028_s2, 128  ;;  %p2268_p11 = scmp.ne.s32.totalorder %s2257_s13, 0 }
  0x8e   : > { %1311 = vmatprep.subr.mxu1 %v1803_v0  ;;  %v811_v25 = vld [vmem:[#allocation8] sm:$0xff]  ;;  %v900_v30 = vld [vmem:[#allocation11 + $0x58] sm:$0xff]  ;;  %v899_v31 = vld [vmem:[#allocation11 + $0x50] sm:$0xff]  ;;  %p1662_p8 = scmp.ne.s32.totalorder %s1028_s2, %s1661_s27  ;;  %s1805_s29 = smov [#allocation14]  }
  0x8f   : > { %1312 = vmatpush3.msra.mxu1 %v576_v6  ;;  %v901_v29 = vld [vmem:[#allocation11 + $0x60] sm:$0xff]  ;;  %v898_v32 = vld [vmem:[#allocation11 + $0x48] sm:$0xff]  ;;  %v896_v34 = vld [vmem:[#allocation11 + $0x38] sm:$0xff]  ;;  %s1665_s16 = sshll.u32 %s1805_s29, 4  ;;  %s1666_s16 = int_to_ptr.vmem [resolvable:$false] %s1665_s16 }
  0x90   : > { %1316 = vmatprep.subr.mxu1 %v1803_v0  ;;  %v897_v33 = vld [vmem:[#allocation11 + $0x40] sm:$0xff]  ;;  %v895_v35 = vld [vmem:[#allocation11 + $0x30] sm:$0xff]  ;;  %v894_v36 = vld [vmem:[#allocation11 + $0x28] sm:$0xff]  ;;  %p1663_p0 = pnand %p1662_p8, %p2268_p11  ;;  %s1667_s12 = scalar_lea.vmem %s1666_s16, 256 }
  0x91   : > { %v893_v37 = vld [vmem:[#allocation11 + $0x20] sm:$0xff]  ;;  %v892_v38 = vld [vmem:[#allocation11 + $0x18] sm:$0xff]  ;;  %v891_v39 = vld [vmem:[#allocation11 + $0x10] sm:$0xff]  ;;  %p1668_p5 = scmp.lt.s32.totalorder %s1028_s2, %s1666_s16  ;;  %p1669_p9 = scmp.lt.s32.totalorder %s1667_s12, %s1661_s27 }
  0x92   : > { %v890_v50 = vld [vmem:[#allocation11 + $0x8] sm:$0xff]  ;;  %v889_v51 = vld [vmem:[#allocation11] sm:$0xff]  ;;  %p1664_p13 = pneg %p1663_p0 }
  0x93   : > { %v976_v55 = vld [vmem:[%s424_s28] sm:$0xff]  ;;  %p1670_p10 = por %p1669_p9, %p1668_p5 }
  0x94   : > { %v1500_v7 = vpop.eup %1499  ;;  %977 = vst [vmem:[%s2128_s15] sm:$0xff] %v976_v55 }
  0x95   : > { %v1502_v8 = vpop.eup %1501  ;;  %1299 = vmatpush3.msk.msra.mxu0 %vm502_vm1, %v1500_v7  ;;  %p1671_p1 = pnand %p1670_p10, %p1664_p13 }
  0x96   : > { %1300 = vmatprep.subr.mxu0 %v1803_v0 }
  0x97   : > { %1301 = vmatpush3.msra.mxu0 %v1502_v8 }
  0x98   : > { %1303 = vmatmul.mubr.msk.f32.vlgmr.msra.gmra.mxu0 %vm498_vm2, %v497_v9  ;;  %1353 = vmatprep.subr.mxu0 %v1803_v0 }
  0x99   : > { %1385 = vmatprep.mubr.msk.f32.mxu0 %vm1804_vm0, %v1803_v0  ;;  %1354 = vmatpush3.msra.mxu0 %v904_v26 }
  0x9a   : > { %1355 = vmatprep.subr.mxu0 %v1803_v0 }
  0x9b   : > { %1356 = vmatpush3.msra.mxu0 %v903_v27 }
  0x9c   : > { %1357 = vmatprep.subr.mxu0 %v1803_v0 }
  0x9d   : > { %1358 = vmatpush3.msra.mxu0 %v902_v28 }
  0x9e   : > { %1359 = vmatprep.subr.mxu0 %v1803_v0 }
  0x9f   : > { %1360 = vmatpush3.msra.mxu0 %v901_v29 }
  0xa0   : > { %1361 = vmatprep.subr.mxu0 %v1803_v0 }
  0xa1   : > { %1362 = vmatpush3.msra.mxu0 %v900_v30 }
  0xa2   : > { %1363 = vmatprep.subr.mxu0 %v1803_v0 }
  0xa3   : > { %1364 = vmatpush3.msra.mxu0 %v899_v31 }
  0xa4   : > { %1365 = vmatprep.subr.mxu0 %v1803_v0 }
  0xa5   : > { %1366 = vmatpush3.msra.mxu0 %v898_v32 }
  0xa6   : > { %1367 = vmatprep.subr.mxu0 %v1803_v0 }
  0xa7   : > { %1368 = vmatpush3.msra.mxu0 %v897_v33 }
  0xa8   : > { %1369 = vmatprep.subr.mxu0 %v1803_v0 }
  0xa9   : > { %1370 = vmatpush3.msra.mxu0 %v896_v34 }
  0xaa   : > { %1371 = vmatprep.subr.mxu0 %v1803_v0 }
  0xab   : > { %1372 = vmatpush3.msra.mxu0 %v895_v35 }
  0xac   : > { %1373 = vmatprep.subr.mxu0 %v1803_v0 }
  0xad   : > { %1374 = vmatpush3.msra.mxu0 %v894_v36 }
  0xae   : > { %1375 = vmatprep.subr.mxu0 %v1803_v0 }
  0xaf   : > { %1376 = vmatpush3.msra.mxu0 %v893_v37 }
  0xb0   : > { %1377 = vmatprep.subr.mxu0 %v1803_v0 }
  0xb1   : > { %1378 = vmatpush3.msra.mxu0 %v892_v38 }
  0xb2   : > { %1379 = vmatprep.subr.mxu0 %v1803_v0 }
  0xb3   : > { %1380 = vmatpush3.msra.mxu0 %v891_v39 }
  0xb4   : > { %1381 = vmatprep.subr.mxu0 %v1803_v0 }
  0xb5   : > { %1382 = vmatpush3.msra.mxu0 %v890_v50 }
  0xb6   : > { %1383 = vmatprep.subr.mxu0 %v1803_v0 }
  0xb7   : > { %1384 = vmatpush3.msra.mxu0 %v889_v51 }
 0x158   : > { %v572_v11 = vpop.f32.mrf.mxu0 }
 0x159   : > { %1314 = vmatmul.mubr.msk.f32.vlgmr.msra.gmra.mxu1 %vm580_vm3, %v572_v11 }
 0x15a   : > { %1317 = vmatpush3.msra.mxu1 %v662_v10  ;;  %v1304_v13 = vpop.f32.mrf.mxu0  ;;  %1332 = vmatprep.mubr.msk.f32.mxu1 %vm1804_vm0, %v1803_v0 }
 0x15b   : > { %1318 = vmatprep.subr.mxu1 %v1803_v0 }
 0x15c   : > { %1319 = vmatpush3.msra.mxu1 %v661_v12 }
 0x15d   : > { %1320 = vmatprep.subr.mxu1 %v1803_v0 }
 0x15e   : > { %1321 = vmatpush3.msra.mxu1 %v660_v14 }
 0x15f   : > { %1322 = vmatprep.subr.mxu1 %v1803_v0 }
 0x160   : > { %1323 = vmatpush3.msra.mxu1 %v659_v15 }
 0x161   : > { %1324 = vmatprep.subr.mxu1 %v1803_v0 }
 0x162   : > { %1325 = vmatpush3.msra.mxu1 %v658_v16 }
 0x163   : > { %1326 = vmatprep.subr.mxu1 %v1803_v0 }
 0x164   : > { %1327 = vmatpush3.msra.mxu1 %v657_v17 }
 0x165   : > { %1328 = vmatprep.subr.mxu1 %v1803_v0 }
 0x166   : > { %1329 = vmatpush3.msra.mxu1 %v656_v18 }
 0x167   : > { %1330 = vmatprep.subr.mxu1 %v1803_v0 }
 0x168   : > { %1331 = vmatpush3.msra.mxu1 %v655_v19 }
 0x169   : > { %1333 = vmatmul.mubr.msk.f32.vlgmr.msra.gmra.mxu1 %vm663_vm4, %v654_v20  ;;  %1335 = vmatprep.subr.mxu1 %v1803_v0 }
 0x16a   : > { %1336 = vmatpush3.msk.msra.mxu1 %vm502_vm1, %v1500_v7  ;;  %1339 = vmatprep.mubr.msk.f32.mxu1 %vm1804_vm0, %v1803_v0 }
 0x16b   : > { %1337 = vmatprep.subr.mxu1 %v1803_v0 }
 0x16c   : > { %1338 = vmatpush3.msra.mxu1 %v1502_v8 }
 0x16d   : > { %1340 = vmatmul.mubr.msk.f32.vlgmr.msra.gmra.mxu1 %vm498_vm2, %v737_v21  ;;  %1342 = vmatprep.subr.mxu1 %v1803_v0 }
 0x16e   : > { %1350 = vmatprep.mubr.msk.f32.mxu1 %vm1804_vm0, %v1803_v0  ;;  %1343 = vmatpush3.msra.mxu1 %v814_v22 }
 0x16f   : > { %1344 = vmatprep.subr.mxu1 %v1803_v0 }
 0x170   : > { %1345 = vmatpush3.msra.mxu1 %v813_v23 }
 0x171   : > { %1346 = vmatprep.subr.mxu1 %v1803_v0 }
 0x172   : > { %1347 = vmatpush3.msra.mxu1 %v812_v24 }
 0x173   : > { %1348 = vmatprep.subr.mxu1 %v1803_v0 }
 0x174   : > { %1349 = vmatpush3.msra.mxu1 %v811_v25 }
 0x219   : > { %v650_v43 = vpop.f32.mrf.mxu1 }
 0x21a   : > { %v981_v44 = vrot.slane %v650_v43, %v980_v42 }
 0x21b   : > { %v1315_v45 = vpop.f32.mrf.mxu1 }
 0x21c   : > { %982 = vst [vmem:[%s2128_s15 + $0x8] sm:$0xff] %v981_v44  ;;  %983 = vst [vmem:[%s485_s26] sm:$0xff] %v981_v44 }
 0x229   : > { %v733_v46 = vpop.f32.mrf.mxu1 }
 0x22b   : > { %v1334_v47 = vpop.f32.mrf.mxu1 }
 0x22d   : > { %v807_v48 = vpop.f32.mrf.mxu1 }
 0x22e   : > { %1351 = vmatmul.mubr.msk.f32.vlgmr.msra.gmra.mxu1 %vm580_vm3, %v807_v48 }
 0x22f   : > { %v1341_v49 = vpop.f32.mrf.mxu1 }
 0x2ee   : > { %v884_v52 = vpop.f32.mrf.mxu1 }
 0x2ef   : > { %v888_v53 = vmul.f32 %v884_v52, %v733_v46 }
 0x2f0   : > { %v1352_v54 = vpop.f32.mrf.mxu1 }
 0x2f1   : > { %1386 = vmatmul.mubr.f32.vlgmr.msra.gmra.mxu0 %v888_v53 }
 0x2f2   : > { %1674 = shalt.err (!%p1671_p1)
}
 0x2f3   : > { %s1675_s28 = scalar_lea.hbm %s2141_s1, 128  ;;  %s1679_s14 = scalar_lea.hbm %s2234_s10, 256 }
 0x2f4   : > { %p1676_p3 = scmp.ne.s32.totalorder %s2141_s1, %s1675_s28  ;;  %p1680_p6 = scmp.lt.s32.totalorder %s2141_s1, %s2234_s10 }
 0x2f5   : > { %p1681_p2 = scmp.lt.s32.totalorder %s1679_s14, %s1675_s28 }
 0x2f6   : > { %p1677_p4 = pnand %p1676_p3, %p2268_p11 }
 0x2f7   : > { %p1682_p7 = por %p1681_p2, %p1680_p6 }
 0x2f8   : > { %p1678_p12 = pneg %p1677_p4 }
 0x2fa   : > { %p1683_p8 = pnand %p1682_p7, %p1678_p12 }
 0x2fc   : > { %1686 = shalt.err (!%p1683_p8)
}
 0x2fd   : > { %1411 = dma.vmem_to_hbm [thread:$0]  (%p2268_p11), %s1028_s2, 128, %s2141_s1, %s2146_s24  }
 0x2fe   : > { %s1255_s27 = sshll.u32 %s1889_s23, 8  ;;  %s1014_s16 = sshll.u32 %s2128_s15, 4  ;;  %s1015_s16 = int_to_ptr.vmem [resolvable:$true] %s1014_s16 }
 0x2ff   : > { %s1012_s22 = scalar_lea.hbm %s2233_s9, %s1255_s27  ;;  %s990_s28 = scalar_lea.sflag [#allocation4], %s2038_s3 }
 0x300   : > { %s1687_s14 = scalar_lea.vmem %s1015_s16, 256  ;;  %s1806_s8 = smov [#allocation13]  }
 0x301   : > { %p1688_p0 = scmp.ne.s32.totalorder %s1015_s16, %s1687_s14  ;;  %s1691_s29 = sshll.u32 %s1806_s8, 4  ;;  %s1692_s29 = int_to_ptr.vmem [resolvable:$false] %s1691_s29 }
 0x302   : > { %s1693_s21 = scalar_lea.vmem %s1692_s29, 512  ;;  %p1694_p9 = scmp.lt.s32.totalorder %s1015_s16, %s1692_s29 }
 0x303   : > { %p1689_p13 = pnand %p1688_p0, %p2268_p11  ;;  %p1695_p10 = scmp.lt.s32.totalorder %s1693_s21, %s1687_s14 }
 0x305   : > { %p1690_p5 = pneg %p1689_p13  ;;  %p1696_p1 = por %p1695_p10, %p1694_p9 }
 0x307   : > { %p1697_p3 = pnand %p1696_p1, %p1690_p5 }
 0x309   : > { %1700 = shalt.err (!%p1697_p3)
}
 0x30a   : > { %s1701_s15 = scalar_lea.hbm %s1012_s22, 256  ;;  %s1705_s2 = scalar_lea.hbm %s2233_s9, 512 }
 0x30b   : > { %p1702_p4 = scmp.ne.s32.totalorder %s1012_s22, %s1701_s15  ;;  %p1706_p2 = scmp.lt.s32.totalorder %s1012_s22, %s2233_s9 }
 0x30c   : > { %p1707_p7 = scmp.lt.s32.totalorder %s1705_s2, %s1701_s15 }
 0x30d   : > { %p1703_p12 = pnand %p1702_p4, %p2268_p11 }
 0x30e   : > { %p1708_p8 = por %p1707_p7, %p1706_p2 }
 0x30f   : > { %p1704_p6 = pneg %p1703_p12 }
 0x311   : > { %p1709_p0 = pnand %p1708_p8, %p1704_p6 }
 0x313   : > { %1712 = shalt.err (!%p1709_p0)
}
 0x314   : > { %1410 = dma.vmem_to_hbm [thread:$0]  (%p2268_p11), %s1015_s16, 256, %s1012_s22, %s990_s28  }
 0x315   : > { %s492_s21 = scalar_lea.vmem [#allocation16], %s2041_s4  ;;  %s2269_s14 = sshll.u32 %s1889_s23, 7 }
 0x316   : > { %s1040_s26 = sshll.u32 %s492_s21, 4  ;;  %s1038_s15 = scalar_lea.hbm %s2235_s11, %s2269_s14  ;;  %s1041_s26 = int_to_ptr.vmem [resolvable:$true] %s1040_s26 }
 0x317   : > { %s1713_s3 = scalar_lea.vmem %s1041_s26, 128  ;;  %s1807_s16 = smov [#allocation16]  }
 0x318   : > { %p1714_p13 = scmp.ne.s32.totalorder %s1041_s26, %s1713_s3  ;;  %s1717_s4 = sshll.u32 %s1807_s16, 4  ;;  %s1718_s4 = int_to_ptr.vmem [resolvable:$false] %s1717_s4 }
 0x319   : > { %s1719_s22 = scalar_lea.vmem %s1718_s4, 256  ;;  %p1720_p10 = scmp.lt.s32.totalorder %s1041_s26, %s1718_s4 }
 0x31a   : > { %p1715_p5 = pnand %p1714_p13, %p2268_p11  ;;  %p1721_p1 = scmp.lt.s32.totalorder %s1719_s22, %s1713_s3 }
 0x31c   : > { %p1716_p9 = pneg %p1715_p5  ;;  %p1722_p3 = por %p1721_p1, %p1720_p10 }
 0x31e   : > { %p1723_p4 = pnand %p1722_p3, %p1716_p9 }
 0x3b1   : > { %v971_v56 = vpop.f32.mrf.mxu0 }
 0x3b2   : > { %v975_v57 = vmul.f32 0.17677669, %v971_v56 }
 0x3b3   : > { %v1387_v58 = vpop.f32.mrf.mxu0 }
 0x3b4   : > { %v987_v59 = vrot.slane %v975_v57, %v980_v42 }
 0x3b6   : > { %988 = vst [vmem:[%s492_s21] sm:$0xff] %v987_v59 }
 0x3b7   : > { %1726 = shalt.err (!%p1723_p4)
}
 0x3b8   : > { %s1727_s23 = scalar_lea.hbm %s1038_s15, 128  ;;  %s1731_s2 = scalar_lea.hbm %s2235_s11, 256 }
 0x3b9   : > { %p1728_p12 = scmp.ne.s32.totalorder %s1038_s15, %s1727_s23  ;;  %p1732_p7 = scmp.lt.s32.totalorder %s1038_s15, %s2235_s11 }
 0x3ba   : > { %p1733_p8 = scmp.lt.s32.totalorder %s1731_s2, %s1727_s23 }
 0x3bb   : > { %p1729_p6 = pnand %p1728_p12, %p2268_p11 }
 0x3bc   : > { %p1734_p0 = por %p1733_p8, %p1732_p7 }
 0x3bd   : > { %p1730_p2 = pneg %p1729_p6 }
 0x3bf   : > { %p1735_p13 = pnand %p1734_p0, %p1730_p2 }
 0x3c1   : > { %1738 = shalt.err (!%p1735_p13)
}
 0x3c2   : > { %1412 = dma.vmem_to_hbm [thread:$0]  (%p2268_p11), %s1041_s26, 128, %s1038_s15, %s2146_s24  }
 0x3c3 PF: > { %s1052_s21 = sand.u32 1, %s1781_s17   ;;  %p2270_p5 = scmp.ne.s32.totalorder %s2258_s25, 0 }
 0x3c4   : > { %p2271_p9 = scmp.ge.s32.totalorder %s1793_s20, 2  ;;  %s1053_s14 = scalar_lea.sflag [#allocation4], %s1052_s21 }
 0x3c6   : > { %p1437_p10 = pnand %p2271_p9, %p2270_p5 }
 0x3c8   : > { %p1438_p1 = pneg %p1437_p10 }
 0x3ca   : > { %1772 = dma.done.wait (%p1438_p1), %s1053_s14, 256  }
 0x3cb   : > { %1774 = vsyncadd (%p1438_p1), %s1053_s14, 4294967040  ;;  %s2272_s8 = sadd.s32 4294967294, %s1793_s20  }
 0x3cc   : > { %s1061_s29 = sand.u32 1, %s2272_s8  }
 0x3cd   : > { %s1062_s3 = scalar_lea.sflag [#allocation15], %s1061_s29 }
 0x3ce   : > { %1776 = dma.done.wait (%p1438_p1), %s1062_s3, 256  }
 0x3cf   : > { %1778 = vsyncadd (%p1438_p1), %s1062_s3, 4294967040  ;;  %s2273_s13 = sld [smem:[#allocation23_spill]]  ;;  %p31_p11 = scmp.ge.s32.totalorder %s1979_s30, 4  }
 0x3d0   : > { %s2274_s17 = smov %s1785_s18  ;;  %s2275_s18 = smov %s1789_s19 }
 0x3d1   : > { %s2277_s20 = smov %s1979_s30  ;;  %33 = sbr.rel (!%p31_p11) target bundleno = 16 (0x10), region = 153 }
 0x3d5   : > { %s2276_s19 = smov %s2273_s13 }
 0x3d6   :  { %1076 = vsyncpa [#allocation3], 1 }
 0x3d7   :  { %1078 = vsyncpa [#allocation3 + $0x1], 1 }
 0x3d8   :  { %1079 = vsyncpa [#allocation6], 1 }
 0x3d9   :  { %1080 = vsyncpa [#allocation9], 1 }
 0x3da   :  { %1081 = vsyncpa [#allocation12], 1 }
 0x3db   :  { %1082 = vsyncpa [#allocation4], 1 }
 0x3dc   :  { %1084 = vsyncpa [#allocation4 + $0x1], 1 }
 0x3dd   :  { %1085 = vsyncpa [#allocation15], 1 }
 0x3de   :  { %1087 = vsyncpa [#allocation15 + $0x1], 1 }

</bundles_post_ra>
